<compile_context>
chip_gen: v7x
topology: tpu7x:2x2x1
jax: 0.10.0
libtpu: 0.0.40
codegen_flags: <defaults>
</compile_context>

<pallas_src>
import functools

import jax
import jax.numpy as jnp
from jax.experimental import pallas as pl
from jax.experimental.pallas import tpu as pltpu


def _layernorm_kernel(x_ref, a_ref, b_ref, o_ref, *, eps):
    x = x_ref[...].astype(jnp.float32)      # (tile_rows, F) working copy
    a = a_ref[...]                           # (1, F), already f32
    b = b_ref[...]                           # (1, F), already f32
    n = x.shape[-1]

    mean = jnp.mean(x, axis=-1, keepdims=True)
    # torch.std defaults to the unbiased (N-1) estimator; eps is added to std.
    # Don't keep a named `diff` live across the reduction -- recompute
    # (x - mean) in the epilogue so only x (+ the output product) is live.
    var = jnp.sum((x - mean) * (x - mean), axis=-1, keepdims=True) * (
        1.0 / (n - 1)
    )
    std = jnp.sqrt(var)
    # Per-row reciprocal on the (tile_rows, 1) vector -> EUP slot; exact
    # (approx=False) to match the reference bit-tightly.
    inv = pl.reciprocal(std + eps, approx=False)

    o_ref[...] = ((x - mean) * inv * a + b).astype(o_ref.dtype)


def _round_up(x, m):
    return ((x + m - 1) // m) * m


def _pick_tile_rows(rows, features, in_itemsize):
    """Row tile sized against a ~4 MiB f32 working set per block.

    Keeps sublane alignment (16 for packed sub-32-bit inputs, else 8) and,
    when the row count allows it, keeps the grid >= 4 steps so v7x's two
    TensorCores both get work and DMA stays hidden behind compute.
    """
    align = 16 if in_itemsize < 4 else 8
    budget_bytes = 4 * 1024 * 1024           # f32 working bytes per block
    t = budget_bytes // max(features * 4, 1)
    t = max(align, (t // align) * align)

    # Keep at least ~4 grid steps when rows are large enough to split.
    if rows >= 4 * align:
        quarter = max(align, ((rows // 4) // align) * align)
        t = min(t, quarter)

    # Never exceed the (alignment-rounded) row count.
    t = min(t, max(align, _round_up(rows, align)))
    return t


def _vmem_limit_bytes(tile_rows, features, in_itemsize, out_itemsize):
    """Scoped-VMEM limit: double-buffered in/out + f32 intermediates + margin.

    Kept below v7x's 64 MiB physical VMEM per TensorCore; comfortably above
    v5e's 16 MiB default scoped limit so full 2-deep pipelining survives the
    larger tiles.
    """
    blk = tile_rows * features
    est = (
        2 * blk * in_itemsize        # input double-buffer
        + 2 * blk * out_itemsize     # output double-buffer
        + 3 * blk * 4                # compiler-managed f32 intermediates
        + 2 * 2 * features * 4       # gamma/beta double-buffers (tiny)
    )
    est = int(est * 1.25) + (1 << 20)
    return max(32 << 20, min(est, 48 << 20))


def layer_norm(x, a_2, b_2, eps=1e-6, *, tile_rows=None):
    """LayerNorm over the last axis of x, matching the PyTorch module."""
    orig_shape = x.shape
    features = orig_shape[-1]
    assert features >= 2, "unbiased (N-1) std requires at least 2 features"

    rows = 1
    for d in orig_shape[:-1]:
        rows *= d

    x2d = x.reshape(rows, features)
    # Pre-cast params to f32 once in the wrapper (tiny (1, F) rows).
    a2d = a_2.reshape(1, features).astype(jnp.float32)
    b2d = b_2.reshape(1, features).astype(jnp.float32)

    in_itemsize = jnp.dtype(x.dtype).itemsize
    if tile_rows is None:
        tile_rows = _pick_tile_rows(rows, features, in_itemsize)
    align = 16 if in_itemsize < 4 else 8
    tile_rows = max(align, (tile_rows // align) * align)

    # Ragged last block handled by Pallas: rows are independent, tail-block
    # OOB writes are dropped.  No pad / slice => no extra HBM passes.
    grid = (pl.cdiv(rows, tile_rows),)

    kernel = functools.partial(_layernorm_kernel, eps=eps)
    out2d = pl.pallas_call(
        kernel,
        out_shape=jax.ShapeDtypeStruct((rows, features), x.dtype),
        grid_spec=pltpu.PrefetchScalarGridSpec(
            num_scalar_prefetch=0,
            grid=grid,
            in_specs=[
                pl.BlockSpec((tile_rows, features), lambda i: (i, 0)),
                pl.BlockSpec((1, features), lambda i: (0, 0)),
                pl.BlockSpec((1, features), lambda i: (0, 0)),
            ],
            out_specs=pl.BlockSpec((tile_rows, features), lambda i: (i, 0)),
        ),
        compiler_params=pltpu.CompilerParams(
            dimension_semantics=("parallel",),
            vmem_limit_bytes=_vmem_limit_bytes(
                tile_rows, features, in_itemsize,
                jnp.dtype(x.dtype).itemsize,
            ),
        ),
    )(x2d, a2d, b2d)

    return out2d.reshape(orig_shape)


if __name__ == "__main__":
    key = jax.random.PRNGKey(0)
    batch, seq, hidden = 2, 8, 32

    x = jax.random.normal(key, (batch, seq, hidden), dtype=jnp.float32)
    # Parameters exactly as in the module's __init__: ones / zeros.
    a_2 = jnp.ones((hidden,), dtype=jnp.float32)
    b_2 = jnp.zeros((hidden,), dtype=jnp.float32)

    out = layer_norm(x, a_2, b_2, eps=1e-6)
    out = jax.block_until_ready(out)

    # Reference check (pure JAX, same math as the torch forward:
    # unbiased N-1 variance, eps added to std).
    mean = jnp.mean(x, axis=-1, keepdims=True)
    std = jnp.sqrt(
        jnp.sum((x - mean) ** 2, axis=-1, keepdims=True) / (hidden - 1)
    )
    ref = a_2 * (x - mean) / (std + 1e-6) + b_2
    assert jnp.allclose(out, ref, atol=1e-5, rtol=1e-5)

    print("KERNEL_OK")
</pallas_src>

<mosaic_0001>
module attributes {stable_mosaic.version = 11 : i64} {
  func.func @_layernorm_kernel(%arg0: i32, %arg1: memref<16x32xf32, #tpu.memory_space<vmem>>, %arg2: memref<1x32xf32, #tpu.memory_space<vmem>>, %arg3: memref<1x32xf32, #tpu.memory_space<vmem>>, %arg4: memref<16x32xf32, #tpu.memory_space<vmem>>) attributes {dimension_semantics = [#tpu.dimension_semantics<parallel>], iteration_bounds = array<i64: 1>, scalar_prefetch = 0 : i64, scratch_operands = 0 : i64, tpu.core_type = #tpu.core_type<tc>, window_params = [{transform_indices = @transform_0, window_bounds = array<i64: 16, 32>}, {pipeline_mode = #tpu.pipeline_mode<synchronous>, transform_indices = @transform_1, window_bounds = array<i64: 1, 32>}, {pipeline_mode = #tpu.pipeline_mode<synchronous>, transform_indices = @transform_2, window_bounds = array<i64: 1, 32>}, {transform_indices = @transform_3, window_bounds = array<i64: 16, 32>}]} {
    %c0 = arith.constant 0 : index
    %c0_0 = arith.constant 0 : index
    %0 = vector.load %arg1[%c0, %c0_0] : memref<16x32xf32, #tpu.memory_space<vmem>>, vector<16x32xf32>
    %c0_1 = arith.constant 0 : index
    %c0_2 = arith.constant 0 : index
    %1 = vector.load %arg2[%c0_1, %c0_2] : memref<1x32xf32, #tpu.memory_space<vmem>>, vector<1x32xf32>
    %c0_3 = arith.constant 0 : index
    %c0_4 = arith.constant 0 : index
    %2 = vector.load %arg3[%c0_3, %c0_4] : memref<1x32xf32, #tpu.memory_space<vmem>>, vector<1x32xf32>
    %cst = arith.constant dense<0.000000e+00> : vector<16xf32>
    %3 = vector.multi_reduction <add>, %0, %cst [1] : vector<16x32xf32> to vector<16xf32>
    %4 = vector.shape_cast %3 : vector<16xf32> to vector<16x1xf32>
    %cst_5 = arith.constant 3.200000e+01 : f32
    %5 = vector.broadcast %cst_5 : f32 to vector<16x1xf32>
    %6 = arith.divf %4, %5 : vector<16x1xf32>
    %7 = vector.broadcast %6 : vector<16x1xf32> to vector<16x32xf32>
    %8 = arith.subf %0, %7 : vector<16x32xf32>
    %9 = vector.broadcast %6 : vector<16x1xf32> to vector<16x32xf32>
    %10 = arith.subf %0, %9 : vector<16x32xf32>
    %11 = arith.mulf %8, %10 : vector<16x32xf32>
    %cst_6 = arith.constant dense<0.000000e+00> : vector<16xf32>
    %12 = vector.multi_reduction <add>, %11, %cst_6 [1] : vector<16x32xf32> to vector<16xf32>
    %13 = vector.shape_cast %12 : vector<16xf32> to vector<16x1xf32>
    %cst_7 = arith.constant 0.0322580636 : f32
    %14 = vector.broadcast %cst_7 : f32 to vector<16x1xf32>
    %15 = arith.mulf %13, %14 : vector<16x1xf32>
    %16 = math.sqrt %15 : vector<16x1xf32>
    %cst_8 = arith.constant 9.99999997E-7 : f32
    %17 = vector.broadcast %cst_8 : f32 to vector<16x1xf32>
    %18 = arith.addf %16, %17 : vector<16x1xf32>
    %19 = tpu.reciprocal %18 : vector<16x1xf32> -> vector<16x1xf32>
    %20 = vector.broadcast %6 : vector<16x1xf32> to vector<16x32xf32>
    %21 = arith.subf %0, %20 : vector<16x32xf32>
    %22 = vector.broadcast %19 : vector<16x1xf32> to vector<16x32xf32>
    %23 = arith.mulf %21, %22 : vector<16x32xf32>
    %24 = vector.broadcast %1 : vector<1x32xf32> to vector<16x32xf32>
    %25 = arith.mulf %23, %24 : vector<16x32xf32>
    %26 = vector.broadcast %2 : vector<1x32xf32> to vector<16x32xf32>
    %27 = arith.addf %25, %26 : vector<16x32xf32>
    %c0_9 = arith.constant 0 : index
    %c0_10 = arith.constant 0 : index
    %28 = vector.load %arg4[%c0_9, %c0_10] : memref<16x32xf32, #tpu.memory_space<vmem>>, vector<16x32xf32>
    tpu.vector_store %arg4[%c0_9, %c0_10], %27 {strides = array<i32>} : memref<16x32xf32, #tpu.memory_space<vmem>>, vector<16x32xf32>,
    return
  }
  func.func @transform_0(%arg0: i32) -> (i32, i32) {
    %c0_i32 = arith.constant 0 : i32
    %c0_i32_0 = arith.constant 0 : i32
    return %arg0, %c0_i32 : i32, i32
  }
  func.func @transform_1(%arg0: i32) -> (i32, i32) {
    %c0_i32 = arith.constant 0 : i32
    %c0_i32_0 = arith.constant 0 : i32
    %c0_i32_1 = arith.constant 0 : i32
    return %c0_i32, %c0_i32_0 : i32, i32
  }
  func.func @transform_2(%arg0: i32) -> (i32, i32) {
    %c0_i32 = arith.constant 0 : i32
    %c0_i32_0 = arith.constant 0 : i32
    %c0_i32_1 = arith.constant 0 : i32
    return %c0_i32, %c0_i32_0 : i32, i32
  }
  func.func @transform_3(%arg0: i32) -> (i32, i32) {
    %c0_i32 = arith.constant 0 : i32
    %c0_i32_0 = arith.constant 0 : i32
    return %arg0, %c0_i32 : i32, i32
  }
}

</mosaic_0001>

<bundles_post_ra>
// kernel: tpu_custom_call.1
= control target key start
LH: loop header
LB: loop body
LE: loop exit
PB: predicated region body
PF: predicated region fallthrough
CT: control target
= control target key end

     0   :  { %8 = vsyncpa [#allocation3], 0  ;;  %s238_s0 = inlined_call_operand.hbm [shape: f32[16,32], index: 0, kind: input, shape index: {}]   ;;  %s239_s1 = inlined_call_operand.vmem [shape: f32[1,32], index: 1, kind: input, shape index: {}]   ;;  %s240_s2 = inlined_call_operand.vmem [shape: f32[1,32], index: 2, kind: input, shape index: {}]   ;;  %s241_s3 = inlined_call_operand.hbm [shape: f32[16,32], index: 3, kind: output, shape index: {}]  }
   0x1   :  { %9 = vsyncpa [#allocation4], 0  ;;  %s172_s12 = smov [#allocation2]   ;;  %s124_s16 = scalar_lea.hbm %s238_s0, 256 }
   0x2   :  { %s15_s13 = sshll.u32 %s172_s12, 4  ;;  %p125_p0 = scmp.ne.s32.totalorder %s238_s0, %s124_s16  ;;  %s16_s13 = int_to_ptr.vmem [resolvable:$true] %s15_s13 }
   0x3   :  { %p128_p1 = scmp.lt.u32.totalorder %s124_s16, %s238_s0 }
   0x5   :  { %p130_p2 = pnand %p128_p1, %p125_p0 }
   0x7   :  { %133 = shalt.err (!%p130_p2)
}
   0x8   :  { %s134_s21 = scalar_lea.vmem %s16_s13, 256  ;;  %p139_p4 = scmp.lt.s32.totalorder %s16_s13, %s16_s13 }
   0x9   :  { %p135_p3 = scmp.ne.s32.totalorder %s16_s13, %s134_s21  ;;  %p140_p5 = scmp.lt.s32.totalorder %s134_s21, %s134_s21 }
   0xb   :  { %p141_p6 = por %p140_p5, %p139_p4 }
   0xd   :  { %p142_p7 = pnand %p141_p6, %p135_p3 }
   0xf   :  { %145 = shalt.err (!%p142_p7)
}
  0x10   :  { %s173_s22 = smov 128   ;;  %s174_s23 = smov 8  }
  0x11   :  { %21 = dma.hbm_to_vmem [thread:$0]  %s238_s0, 256, %s16_s13, [#allocation3], %s173_s22, %s173_s22, %s174_s23  }
  0x12   :  { %168 = dma.done.wait [#allocation3], 256  }
  0x13   :  { %169 = vsyncadd [#allocation3], 4294967040  ;;  %vm33_vm0 = vcmask 261120   ;;  %v29_v0 = vld [vmem:[#allocation2] sm:$0xff]  ;;  %v30_v1 = vld [vmem:[#allocation2 + $0x8] sm:$0xff]  ;;  %s175_s29 = smov [#allocation5]  }
  0x14   :  { %v34_v2 = vsel %vm33_vm0, %v29_v0, 0.0  ;;  %v37_v3 = vsel %vm33_vm0, %v30_v1, 0.0  ;;  %v110_v31 = vld [vmem:[%s239_s1] ss:$0 sm:$0xff]  ;;  %s98_s30 = sshll.u32 %s175_s29, 4  ;;  %s99_s30 = int_to_ptr.vmem [resolvable:$true] %s98_s30 }
  0x15   :  { %35 = vadd.xlane.f32.xlu0 %v34_v2  ;;  %v111_v33 = vld [vmem:[%s240_s2] ss:$0 sm:$0xff]  ;;  %s146_s4 = scalar_lea.vmem %s99_s30, 256  ;;  %p151_p9 = scmp.lt.s32.totalorder %s99_s30, %s99_s30 }
  0x16   :  { %p147_p8 = scmp.ne.s32.totalorder %s99_s30, %s146_s4  ;;  %p152_p10 = scmp.lt.s32.totalorder %s146_s4, %s146_s4 }
  0x18   :  { %p153_p11 = por %p152_p10, %p151_p9 }
  0x19   :  { %38 = vadd.xlane.f32.xlu0 %v37_v3 }
  0x1a   :  { %p154_p12 = pnand %p153_p11, %p147_p8 }
  0xa2   :  { %v36_v4 = vpop.xlane.xlu0 %35 }
  0xa3   :  { %v41_v5 = vmul.f32 0.03125, %v36_v4 }
  0xa5   :  { %v43_v6 = vsub.f32 %v29_v0, %v41_v5 }
  0xa6   :  { %v39_v7 = vpop.xlane.xlu0 %38 }
  0xa7   :  { %v42_v8 = vmul.f32 0.03125, %v39_v7  ;;  %v45_v9 = vmul.f32 %v43_v6, %v43_v6 }
  0xa9   :  { %v44_v10 = vsub.f32 %v30_v1, %v42_v8  ;;  %v47_v11 = vsel %vm33_vm0, %v45_v9, 0.0 }
  0xaa   :  { %48 = vadd.xlane.f32.xlu1 %v47_v11 }
  0xab   :  { %v46_v12 = vmul.f32 %v44_v10, %v44_v10 }
  0xad   :  { %v50_v13 = vsel %vm33_vm0, %v46_v12, 0.0 }
  0xae   :  { %51 = vadd.xlane.f32.xlu1 %v50_v13 }
 0x137   :  { %v49_v14 = vpop.xlane.xlu1 %48 }
 0x138   :  { %v53_v15 = vmul.f32 0.032258064, %v49_v14 }
 0x13a   :  { %116 = vrsqrt.f32 %v53_v15  ;;  %vm57_vm1 = vcmp.eq.f32.partialorder %v53_v15, inf  ;;  %v60_v20 = vand.u32 2147483648, %v53_v15  ;;  %vm59_vm2 = vcmp.eq.f32.partialorder %v53_v15, 0.0 }
 0x13b   :  { %v52_v16 = vpop.xlane.xlu1 %51 }
 0x13c   :  { %v54_v17 = vmul.f32 0.032258064, %v52_v16 }
 0x13e   :  { %118 = vrsqrt.f32 %v54_v17  ;;  %vm64_vm3 = vcmp.eq.f32.partialorder %v54_v17, inf  ;;  %v67_v26 = vand.u32 2147483648, %v54_v17  ;;  %vm66_vm4 = vcmp.eq.f32.partialorder %v54_v17, 0.0 }
 0x144   :  { %v117_v18 = vpop.eup %116 }
 0x145   :  { %v56_v19 = vmul.f32 %v117_v18, %v53_v15 }
 0x147   :  { %v58_v21 = vsel %vm57_vm1, %v53_v15, %v56_v19 }
 0x148   :  { %v119_v22 = vpop.eup %118  ;;  %v61_v23 = vsel %vm59_vm2, %v60_v20, %v58_v21 }
 0x149   :  { %v69_v24 = vadd.f32 1e-06, %v61_v23  ;;  %v63_v25 = vmul.f32 %v119_v22, %v54_v17 }
 0x14b   :  { %120 = vrcp.f32 %v69_v24  ;;  %v65_v27 = vsel %vm64_vm3, %v54_v17, %v63_v25 }
 0x14c   :  { %v68_v28 = vsel %vm66_vm4, %v67_v26, %v65_v27 }
 0x14d   :  { %v70_v29 = vadd.f32 1e-06, %v68_v28 }
 0x14f   :  { %122 = vrcp.f32 %v70_v29 }
 0x155   :  { %v121_v30 = vpop.eup %120 }
 0x156   :  { %v73_v32 = vmul.f32 %v121_v30, %v43_v6 }
 0x158   :  { %v81_v34 = vmul.f32 %v110_v31, %v73_v32 }
 0x159   :  { %v123_v35 = vpop.eup %122 }
 0x15a   :  { %v74_v36 = vmul.f32 %v123_v35, %v44_v10  ;;  %v89_v37 = vadd.f32 %v111_v33, %v81_v34 }
 0x15c   :  { %v82_v38 = vmul.f32 %v110_v31, %v74_v36  ;;  %91 = vst.msk [vmem:[#allocation5] sm:$0xff] %vm33_vm0, %v89_v37 }
 0x15e   :  { %v90_v39 = vadd.f32 %v111_v33, %v82_v38 }
 0x160   :  { %92 = vst.msk [vmem:[#allocation5 + $0x8] sm:$0xff] %vm33_vm0, %v90_v39 }
 0x161   :  { %157 = shalt.err (!%p154_p12)
}
 0x162   :  { %s158_s5 = scalar_lea.hbm %s241_s3, 256 }
 0x163   :  { %p159_p13 = scmp.ne.s32.totalorder %s241_s3, %s158_s5  ;;  %p162_p0 = scmp.lt.u32.totalorder %s158_s5, %s241_s3 }
 0x165   :  { %p164_p1 = pnand %p162_p0, %p159_p13 }
 0x167   :  { %167 = shalt.err (!%p164_p1)
}
 0x168   :  { %104 = dma.vmem_to_hbm [thread:$0]  %s99_s30, 256, %s241_s3, [#allocation4], %s173_s22, %s173_s22, %s174_s23  }
 0x169   :  { %170 = dma.done.wait [#allocation4], 256  }
 0x16a   :  { %171 = vsyncadd [#allocation4], 4294967040 }
 0x16b   :  { %108 = vsyncpa [#allocation3], 1 }
 0x16c   :  { %109 = vsyncpa [#allocation4], 1 }

</bundles_post_ra>
